<compile_context>
chip_gen: v5e
topology: v5e:2x2
jax: 0.10.0
libtpu: 0.0.40
codegen_flags: <defaults>
</compile_context>

<pallas_src>
import functools

import jax
import jax.numpy as jnp
from jax import lax
from jax.experimental import pallas as pl
from jax.experimental.pallas import tpu as pltpu

_EPS = 1e-5


def _conv_sic_kernel(x_ref, s_ref, a_ref, t2_ref, out_ref, *, residual):
    """One image per grid step; everything is lane-dense (last dim = W*C).

    x_ref  : (H, W*C_in)          bf16  folded input (also the residual)
    s_ref  : (K, H, H)            bf16  0/1 row-shift (zero-halo) selectors
    a_ref  : (K, W*C_in, W*C_out) bf16  banded dw-conv * BN1 * 1x1 * BN2 weights
    t2_ref : (1, W*C_out)         f32   folded bias row
    out_ref: (H, W*C_out)         bf16
    """
    K = s_ref.shape[0]
    x = x_ref[...]                                       # bf16 (H, W*C_in)

    def tap(k):
        # Row shift with zero boundary: (S_k @ x)[i, :] == x[i + k - K//2, :]
        # (or 0 outside the frame).  Exact: S_k is a 0/1 selector.
        xs = jnp.dot(s_ref[k], x, preferred_element_type=jnp.float32)
        # Banded matrix folds horizontal dw taps, BN1 scale, 1x1 conv, BN2.
        return jnp.dot(xs.astype(jnp.bfloat16), a_ref[k],
                       preferred_element_type=jnp.float32)

    # f32 accumulator, initialized from the first tap + folded bias.
    acc = tap(0) + t2_ref[...]
    for k in range(1, K):
        acc = acc + tap(k)

    if residual:                                         # only when C_in == C_out
        acc = acc + x.astype(jnp.float32)
    out_ref[...] = jnp.maximum(acc, 0.0).astype(out_ref.dtype)


def _conv_sic_forward_impl(x_nchw, params, kernel_size):
    N, C_in, H, W = x_nchw.shape
    K = kernel_size
    p = K // 2
    C_out = params["w_pw"].shape[0]
    residual = (C_in == C_out)

    # ---- fold BN1 / BN2 / conv biases (eval mode) into the conv weights ----
    s1 = params["g1"] * lax.rsqrt(params["v1"] + _EPS)             # (C_in,)
    t1 = params["b1"] + (params["b_dw"] - params["m1"]) * s1        # (C_in,)
    s2 = params["g2"] * lax.rsqrt(params["v2"] + _EPS)             # (C_out,)
    w_pw = params["w_pw"].reshape(C_out, C_in)
    w_dw = params["w_dw"].reshape(C_in, K, K)
    # y2[o] = sum_c W2[o,c] * dwconv(x)[c] + T2[o]   (all BN / biases folded)
    W2 = s2[:, None] * w_pw * s1[None, :]                           # (C_out, C_in)
    T2 = params["b2"] + s2 * (params["b_pw"] - params["m2"] + w_pw @ t1)

    # ---- banded per-vertical-tap matrices A_k (lane-dense formulation) -----
    # A_k[j'*C_in + c, j*C_out + o] = w_dw[c, k, j'-j+p] * W2[o, c]  (|j'-j|<=p)
    jj = jnp.arange(W)
    dx = jj[:, None] - jj[None, :]                                  # j' - j
    band = jnp.abs(dx) <= p
    dx_idx = jnp.clip(dx + p, 0, K - 1)

    def build_a(k):
        taps = jnp.where(band[None], w_dw[:, k, :][:, dx_idx], 0.0)  # (C_in, W, W)
        a = jnp.einsum("cuv,oc->ucvo", taps, W2)                     # (W, C_in, W, C_out)
        return a.reshape(W * C_in, W * C_out)

    A = jnp.stack([build_a(k) for k in range(K)]).astype(jnp.bfloat16)

    # ---- row-shift (zero-halo) selector matrices S_k ------------------------
    ii = jnp.arange(H)
    S = jnp.stack([(ii[None, :] == ii[:, None] + (k - p)) for k in range(K)])
    S = S.astype(jnp.bfloat16)                                       # (K, H, H)

    T2_row = jnp.tile(T2, W).reshape(1, W * C_out).astype(jnp.float32)

    # ---- lane-dense bf16 activations: NCHW -> (N, H, W*C) -------------------
    # TODO(synk): if the surrounding model can stay NHWC/bf16, drop this
    # boundary transpose+cast (one extra HBM round trip for a mem-bound op).
    x_f = jnp.transpose(x_nchw, (0, 2, 3, 1)).reshape(N, H, W * C_in)
    x_f = x_f.astype(jnp.bfloat16)

    kernel = functools.partial(_conv_sic_kernel, residual=residual)
    out_f = pl.pallas_call(
        kernel,
        out_shape=jax.ShapeDtypeStruct((N, H, W * C_out), jnp.bfloat16),
        grid=(N,),
        in_specs=[
            pl.BlockSpec((None, H, W * C_in), lambda n: (n, 0, 0)),
            # grid-invariant parameters (constant index maps -> not re-fetched)
            pl.BlockSpec((K, H, H), lambda n: (0, 0, 0)),
            pl.BlockSpec((K, W * C_in, W * C_out), lambda n: (0, 0, 0)),
            pl.BlockSpec((1, W * C_out), lambda n: (0, 0)),
        ],
        out_specs=pl.BlockSpec((None, H, W * C_out), lambda n: (n, 0, 0)),
        compiler_params=pltpu.CompilerParams(
            dimension_semantics=("parallel",),
            vmem_limit_bytes=32 * 1024 * 1024,
        ),
    )(x_f, S, A, T2_row)

    out = out_f.reshape(N, H, W, C_out)
    return jnp.transpose(out, (0, 3, 1, 2)).astype(jnp.float32)


conv_sic_forward = jax.jit(_conv_sic_forward_impl, static_argnums=(2,))


def conv_sic_reference(x, params, K):
    """Pure-JAX reference reproducing the PyTorch forward (eval-mode BN)."""
    N, C_in, H, W = x.shape
    p = K // 2
    C_out = params["w_pw"].shape[0]

    def bn(y, g, b, m, v):
        return (y - m[None, :, None, None]) / jnp.sqrt(v + _EPS)[None, :, None, None] \
            * g[None, :, None, None] + b[None, :, None, None]

    y = lax.conv_general_dilated(
        x, params["w_dw"], window_strides=(1, 1), padding=((p, p), (p, p)),
        feature_group_count=C_in, dimension_numbers=("NCHW", "OIHW", "NCHW"))
    y = y + params["b_dw"][None, :, None, None]
    y = bn(y, params["g1"], params["b1"], params["m1"], params["v1"])

    z = lax.conv_general_dilated(
        y, params["w_pw"], window_strides=(1, 1), padding=((0, 0), (0, 0)),
        dimension_numbers=("NCHW", "OIHW", "NCHW"))
    z = z + params["b_pw"][None, :, None, None]
    z = bn(z, params["g2"], params["b2"], params["m2"], params["v2"])

    if C_in == C_out:
        z = z + x
    return jnp.maximum(z, 0.0)


def make_params(key, in_channels, out_channels, K):
    ks = jax.random.split(key, 10)
    return {
        # depthwise conv: (C_in, 1, K, K), bias (C_in,)
        "w_dw": 0.1 * jax.random.normal(ks[0], (in_channels, 1, K, K), jnp.float32),
        "b_dw": 0.1 * jax.random.normal(ks[1], (in_channels,), jnp.float32),
        # BN1 (eval mode running stats)
        "g1": 1.0 + 0.1 * jax.random.normal(ks[2], (in_channels,), jnp.float32),
        "b1": 0.1 * jax.random.normal(ks[3], (in_channels,), jnp.float32),
        "m1": 0.05 * jax.random.normal(ks[4], (in_channels,), jnp.float32),
        "v1": 1.0 + 0.1 * jax.random.uniform(ks[5], (in_channels,), jnp.float32),
        # pointwise 1x1 conv: (C_out, C_in, 1, 1), bias (C_out,)
        "w_pw": 0.1 * jax.random.normal(ks[6], (out_channels, in_channels, 1, 1), jnp.float32),
        "b_pw": 0.1 * jax.random.normal(ks[7], (out_channels,), jnp.float32),
        # BN2
        "g2": 1.0 + 0.1 * jax.random.normal(ks[8], (out_channels,), jnp.float32),
        "b2": 0.1 * jax.random.normal(ks[9], (out_channels,), jnp.float32),
        "m2": jnp.zeros((out_channels,), jnp.float32),
        "v2": jnp.ones((out_channels,), jnp.float32),
    }


if __name__ == "__main__":
    key = jax.random.PRNGKey(0)
    k_x, k_p = jax.random.split(key)

    N, C_in, C_out, H, W, K = 2, 4, 4, 16, 16, 3   # in==out -> residual path
    x = jax.random.normal(k_x, (N, C_in, H, W), jnp.float32)
    params = make_params(k_p, C_in, C_out, K)

    out = jax.block_until_ready(conv_sic_forward(x, params, K))

    # Reference on the bf16-quantized input (the kernel runs bf16 at the HBM
    # boundary / MXU), so the comparison isolates kernel arithmetic error.
    x_q = x.astype(jnp.bfloat16).astype(jnp.float32)
    ref = jax.block_until_ready(conv_sic_reference(x_q, params, K))

    assert out.shape == (N, C_out, H, W), out.shape
    assert jnp.allclose(out, ref, atol=3e-2, rtol=3e-2), \
        float(jnp.max(jnp.abs(out - ref)))

    print("KERNEL_OK")
</pallas_src>

<mosaic_0001>
module attributes {stable_mosaic.version = 11 : i64} {
  func.func @_conv_sic_kernel(%arg0: i32, %arg1: memref<1x16x64xbf16, #tpu.memory_space<vmem>>, %arg2: memref<3x16x16xbf16, #tpu.memory_space<vmem>>, %arg3: memref<3x64x64xbf16, #tpu.memory_space<vmem>>, %arg4: memref<1x64xf32, #tpu.memory_space<vmem>>, %arg5: memref<1x16x64xbf16, #tpu.memory_space<vmem>>) attributes {dimension_semantics = [#tpu.dimension_semantics<parallel>], iteration_bounds = array<i64: 2>, scalar_prefetch = 0 : i64, scratch_operands = 0 : i64, tpu.core_type = #tpu.core_type<tc>, window_params = [{transform_indices = @transform_0, window_bounds = array<i64: 1, 16, 64>}, {pipeline_mode = #tpu.pipeline_mode<synchronous>, transform_indices = @transform_1, window_bounds = array<i64: 3, 16, 16>}, {pipeline_mode = #tpu.pipeline_mode<synchronous>, transform_indices = @transform_2, window_bounds = array<i64: 3, 64, 64>}, {pipeline_mode = #tpu.pipeline_mode<synchronous>, transform_indices = @transform_3, window_bounds = array<i64: 1, 64>}, {transform_indices = @transform_4, window_bounds = array<i64: 1, 16, 64>}]} {
    %c0 = arith.constant 0 : index
    %c0_0 = arith.constant 0 : index
    %c0_1 = arith.constant 0 : index
    %0 = vector.load %arg1[%c0, %c0_0, %c0_1] : memref<1x16x64xbf16, #tpu.memory_space<vmem>>, vector<1x16x64xbf16>
    %1 = vector.shape_cast %0 : vector<1x16x64xbf16> to vector<16x64xbf16>
    %c0_2 = arith.constant 0 : index
    %c0_3 = arith.constant 0 : index
    %c0_4 = arith.constant 0 : index
    %2 = vector.load %arg2[%c0_2, %c0_3, %c0_4] : memref<3x16x16xbf16, #tpu.memory_space<vmem>>, vector<1x16x16xbf16>
    %3 = vector.shape_cast %2 : vector<1x16x16xbf16> to vector<16x16xbf16>
    %cst = arith.constant dense<0.000000e+00> : vector<16x64xf32>
    %4 = tpu.matmul %3, %1, %cst {dimension_numbers = #tpu.dot_dimension_numbers<[1], [0], [0], [1], [0, 0, 1, 1], [], []>} : vector<16x16xbf16>, vector<16x64xbf16>, vector<16x64xf32> -> vector<16x64xf32>
    %5 = arith.truncf %4 : vector<16x64xf32> to vector<16x64xbf16>
    %c0_5 = arith.constant 0 : index
    %c0_6 = arith.constant 0 : index
    %c0_7 = arith.constant 0 : index
    %6 = vector.load %arg3[%c0_5, %c0_6, %c0_7] : memref<3x64x64xbf16, #tpu.memory_space<vmem>>, vector<1x64x64xbf16>
    %7 = vector.shape_cast %6 : vector<1x64x64xbf16> to vector<64x64xbf16>
    %cst_8 = arith.constant dense<0.000000e+00> : vector<16x64xf32>
    %8 = tpu.matmul %5, %7, %cst_8 {dimension_numbers = #tpu.dot_dimension_numbers<[1], [0], [0], [1], [0, 0, 1, 1], [], []>} : vector<16x64xbf16>, vector<64x64xbf16>, vector<16x64xf32> -> vector<16x64xf32>
    %c0_9 = arith.constant 0 : index
    %c0_10 = arith.constant 0 : index
    %9 = vector.load %arg4[%c0_9, %c0_10] : memref<1x64xf32, #tpu.memory_space<vmem>>, vector<1x64xf32>
    %10 = vector.broadcast %9 : vector<1x64xf32> to vector<16x64xf32>
    %11 = arith.addf %8, %10 : vector<16x64xf32>
    %c1 = arith.constant 1 : index
    %c0_11 = arith.constant 0 : index
    %c0_12 = arith.constant 0 : index
    %12 = vector.load %arg2[%c1, %c0_11, %c0_12] : memref<3x16x16xbf16, #tpu.memory_space<vmem>>, vector<1x16x16xbf16>
    %13 = vector.shape_cast %12 : vector<1x16x16xbf16> to vector<16x16xbf16>
    %cst_13 = arith.constant dense<0.000000e+00> : vector<16x64xf32>
    %14 = tpu.matmul %13, %1, %cst_13 {dimension_numbers = #tpu.dot_dimension_numbers<[1], [0], [0], [1], [0, 0, 1, 1], [], []>} : vector<16x16xbf16>, vector<16x64xbf16>, vector<16x64xf32> -> vector<16x64xf32>
    %15 = arith.truncf %14 : vector<16x64xf32> to vector<16x64xbf16>
    %c1_14 = arith.constant 1 : index
    %c0_15 = arith.constant 0 : index
    %c0_16 = arith.constant 0 : index
    %16 = vector.load %arg3[%c1_14, %c0_15, %c0_16] : memref<3x64x64xbf16, #tpu.memory_space<vmem>>, vector<1x64x64xbf16>
    %17 = vector.shape_cast %16 : vector<1x64x64xbf16> to vector<64x64xbf16>
    %cst_17 = arith.constant dense<0.000000e+00> : vector<16x64xf32>
    %18 = tpu.matmul %15, %17, %cst_17 {dimension_numbers = #tpu.dot_dimension_numbers<[1], [0], [0], [1], [0, 0, 1, 1], [], []>} : vector<16x64xbf16>, vector<64x64xbf16>, vector<16x64xf32> -> vector<16x64xf32>
    %19 = arith.addf %11, %18 : vector<16x64xf32>
    %c2 = arith.constant 2 : index
    %c0_18 = arith.constant 0 : index
    %c0_19 = arith.constant 0 : index
    %20 = vector.load %arg2[%c2, %c0_18, %c0_19] : memref<3x16x16xbf16, #tpu.memory_space<vmem>>, vector<1x16x16xbf16>
    %21 = vector.shape_cast %20 : vector<1x16x16xbf16> to vector<16x16xbf16>
    %cst_20 = arith.constant dense<0.000000e+00> : vector<16x64xf32>
    %22 = tpu.matmul %21, %1, %cst_20 {dimension_numbers = #tpu.dot_dimension_numbers<[1], [0], [0], [1], [0, 0, 1, 1], [], []>} : vector<16x16xbf16>, vector<16x64xbf16>, vector<16x64xf32> -> vector<16x64xf32>
    %23 = arith.truncf %22 : vector<16x64xf32> to vector<16x64xbf16>
    %c2_21 = arith.constant 2 : index
    %c0_22 = arith.constant 0 : index
    %c0_23 = arith.constant 0 : index
    %24 = vector.load %arg3[%c2_21, %c0_22, %c0_23] : memref<3x64x64xbf16, #tpu.memory_space<vmem>>, vector<1x64x64xbf16>
    %25 = vector.shape_cast %24 : vector<1x64x64xbf16> to vector<64x64xbf16>
    %cst_24 = arith.constant dense<0.000000e+00> : vector<16x64xf32>
    %26 = tpu.matmul %23, %25, %cst_24 {dimension_numbers = #tpu.dot_dimension_numbers<[1], [0], [0], [1], [0, 0, 1, 1], [], []>} : vector<16x64xbf16>, vector<64x64xbf16>, vector<16x64xf32> -> vector<16x64xf32>
    %27 = arith.addf %19, %26 : vector<16x64xf32>
    %28 = arith.extf %1 : vector<16x64xbf16> to vector<16x64xf32>
    %29 = arith.addf %27, %28 : vector<16x64xf32>
    %cst_25 = arith.constant 0.000000e+00 : f32
    %30 = vector.broadcast %cst_25 : f32 to vector<16x64xf32>
    %31 = arith.maximumf %29, %30 : vector<16x64xf32>
    %32 = arith.truncf %31 : vector<16x64xf32> to vector<16x64xbf16>
    %c0_26 = arith.constant 0 : index
    %c0_27 = arith.constant 0 : index
    %c0_28 = arith.constant 0 : index
    %33 = vector.load %arg5[%c0_26, %c0_27, %c0_28] : memref<1x16x64xbf16, #tpu.memory_space<vmem>>, vector<1x16x64xbf16>
    %34 = vector.shape_cast %33 : vector<1x16x64xbf16> to vector<16x64xbf16>
    %35 = vector.shape_cast %32 : vector<16x64xbf16> to vector<1x16x64xbf16>
    tpu.vector_store %arg5[%c0_26, %c0_27, %c0_28], %35 {strides = array<i32>} : memref<1x16x64xbf16, #tpu.memory_space<vmem>>, vector<1x16x64xbf16>,
    return
  }
  func.func @transform_0(%arg0: i32) -> (i32, i32, i32) {
    %c0_i32 = arith.constant 0 : i32
    %c0_i32_0 = arith.constant 0 : i32
    %c0_i32_1 = arith.constant 0 : i32
    return %arg0, %c0_i32, %c0_i32_0 : i32, i32, i32
  }
  func.func @transform_1(%arg0: i32) -> (i32, i32, i32) {
    %c0_i32 = arith.constant 0 : i32
    %c0_i32_0 = arith.constant 0 : i32
    %c0_i32_1 = arith.constant 0 : i32
    %c0_i32_2 = arith.constant 0 : i32
    return %c0_i32, %c0_i32_0, %c0_i32_1 : i32, i32, i32
  }
  func.func @transform_2(%arg0: i32) -> (i32, i32, i32) {
    %c0_i32 = arith.constant 0 : i32
    %c0_i32_0 = arith.constant 0 : i32
    %c0_i32_1 = arith.constant 0 : i32
    %c0_i32_2 = arith.constant 0 : i32
    return %c0_i32, %c0_i32_0, %c0_i32_1 : i32, i32, i32
  }
  func.func @transform_3(%arg0: i32) -> (i32, i32) {
    %c0_i32 = arith.constant 0 : i32
    %c0_i32_0 = arith.constant 0 : i32
    %c0_i32_1 = arith.constant 0 : i32
    return %c0_i32, %c0_i32_0 : i32, i32
  }
  func.func @transform_4(%arg0: i32) -> (i32, i32, i32) {
    %c0_i32 = arith.constant 0 : i32
    %c0_i32_0 = arith.constant 0 : i32
    %c0_i32_1 = arith.constant 0 : i32
    return %arg0, %c0_i32, %c0_i32_0 : i32, i32, i32
  }
}

</mosaic_0001>

<bundles_post_ra>
// kernel: tile.8
= control target key start
LH: loop header
LB: loop body
LE: loop exit
PB: predicated region body
PF: predicated region fallthrough
CT: control target
= control target key end

     0   :  { %s28_s0 = inlined_call_operand.vmem [shape: f32[4], index: 0, kind: input, shape index: {}]   ;;  %s29_s1 = inlined_call_operand.vmem [shape: f32[16,4], index: 1, kind: output, shape index: {}]  }
   0x1   :  { %v4_v0 = vld [vmem:[%s28_s0] ss:$0 sm:$0xff] }
   0x2   :  { %5 = vst [vmem:[%s29_s1] sm:$0xff] %v4_v0 }
   0x3   :  { %8 = vst [vmem:[%s29_s1 + $0x8] sm:$0xff] %v4_v0 }

// kernel: tile.9
= control target key start
LH: loop header
LB: loop body
LE: loop exit
PB: predicated region body
PF: predicated region fallthrough
CT: control target
= control target key end

     0   :  { %s131_s10 = smov 60   ;;  %s132_s11 = smov 52   ;;  %vm3_vm0 = vcmask 31744   ;;  %vm9_vm1 = vcmask 523744   ;;  %vm15_vm2 = vcmask 490944   ;;  %vm21_vm3 = vcmask 458144   ;;  %s207_s0 = inlined_call_operand.vmem [shape: f32[16,4], index: 0, kind: input, shape index: {}]   ;;  %s208_s1 = inlined_call_operand.vmem [shape: f32[1,64], index: 1, kind: output, shape index: {}]  }
   0x1   :  { %v101_v0 = vld [vmem:[%s207_s0 + $0xf] sm:$0x1]   ;;  %v103_v1 = vld [vmem:[%s207_s0 + $0xd] sm:$0x1]   ;;  %v105_v2 = vld [vmem:[%s207_s0 + $0xb] sm:$0x1]  }
   0x2   :  { %7 = vrot.lane.b32.xlu0 %v101_v0, %s131_s10  ;;  %19 = vrot.lane.b32.xlu1 %v103_v1, %s132_s11  ;;  %s133_s14 = smov 44   ;;  %v102_v3 = vld [vmem:[%s207_s0 + $0xe] sm:$0x1]   ;;  %v104_v4 = vld [vmem:[%s207_s0 + $0xc] sm:$0x1]   ;;  %s134_s19 = smov 56  }
   0x3   :  { %31 = vrot.lane.b32.xlu2 %v105_v2, %s133_s14  ;;  %s135_s20 = smov 48   ;;  %v106_v5 = vld [vmem:[%s207_s0 + $0xa] sm:$0x1]   ;;  %s136_s23 = smov 40   ;;  %v107_v6 = vld [vmem:[%s207_s0 + $0x9] sm:$0x1]  }
   0x4   :  { %v108_v7 = vld [vmem:[%s207_s0 + $0x8] sm:$0x1]   ;;  %s137_s28 = smov 36   ;;  %s138_s29 = smov 32   ;;  %v109_v8 = vld [vmem:[%s207_s0 + $0x7] sm:$0x1]  }
   0x5   :  { %s139_s3 = smov 28   ;;  %v110_v9 = vld [vmem:[%s207_s0 + $0x6] sm:$0x1]   ;;  %v111_v10 = vld [vmem:[%s207_s0 + $0x5] sm:$0x1]   ;;  %s140_s8 = smov 24  }
   0x6   :  { %s141_s9 = smov 20   ;;  %v112_v11 = vld [vmem:[%s207_s0 + $0x4] sm:$0x1]   ;;  %s142_s12 = smov 16   ;;  %v113_v12 = vld [vmem:[%s207_s0 + $0x3] sm:$0x1]  }
   0x7   :  { %v114_v13 = vld [vmem:[%s207_s0 + $0x2] sm:$0x1]   ;;  %s143_s17 = smov 12   ;;  %s144_s18 = smov 8   ;;  %v115_v14 = vld [vmem:[%s207_s0 + $0x1] sm:$0x1]  }
   0x8   :  { %s145_s21 = smov 4   ;;  %v2_v15 = vld [vmem:[%s207_s0] sm:$0x1]   ;;  %vm27_vm4 = vcmask 425344   ;;  %vm33_vm5 = vcmask 392544   ;;  %vm39_vm6 = vcmask 359744  }
   0x9   :  { %4 = vst.msk [vmem:[#allocation0] sm:$0x1] %vm3_vm0, %v2_v15   ;;  %vm45_vm7 = vcmask 326944   ;;  %vm51_vm8 = vcmask 294144   ;;  %vm57_vm9 = vcmask 261344   ;;  %vm63_vm10 = vcmask 228544  }
   0xa   :  { %13 = vrot.lane.b32.xlu0 %v102_v3, %s134_s19  ;;  %25 = vrot.lane.b32.xlu1 %v104_v4, %s135_s20  ;;  %vm69_vm11 = vcmask 195744   ;;  %vm75_vm12 = vcmask 162944   ;;  %vm81_vm13 = vcmask 130144   ;;  %vm87_vm14 = vcmask 97344  }
   0xb   :  { %37 = vrot.lane.b32.xlu2 %v106_v5, %s136_s23  ;;  %vm93_vm15 = vcmask 64544  }
  0x12   :  { %43 = vrot.lane.b32.xlu0 %v107_v6, %s137_s28  ;;  %49 = vrot.lane.b32.xlu1 %v108_v7, %s138_s29 }
  0x13   :  { %55 = vrot.lane.b32.xlu2 %v109_v8, %s139_s3 }
  0x1a   :  { %61 = vrot.lane.b32.xlu0 %v110_v9, %s140_s8  ;;  %67 = vrot.lane.b32.xlu1 %v111_v10, %s141_s9 }
  0x1b   :  { %73 = vrot.lane.b32.xlu2 %v112_v11, %s142_s12 }
  0x22   :  { %79 = vrot.lane.b32.xlu0 %v113_v12, %s143_s17  ;;  %85 = vrot.lane.b32.xlu1 %v114_v13, %s144_s18 }
  0x23   :  { %91 = vrot.lane.b32.xlu2 %v115_v14, %s145_s21 }
  0x5d   :  { %v32_v16 = vpop.permute.xlu2 %31  }
  0x65   :  { %v38_v17 = vpop.permute.xlu2 %37  }
  0x6d   :  { %v56_v18 = vpop.permute.xlu2 %55  }
  0x74   :  { %v8_v19 = vpop.permute.xlu0 %7   ;;  %v20_v20 = vpop.permute.xlu1 %19  }
  0x75   :  { %10 = vst.msk [vmem:[#allocation0] sm:$0x1] %vm9_vm1, %v8_v19   ;;  %v74_v21 = vpop.permute.xlu2 %73  }
  0x7c   :  { %v14_v22 = vpop.permute.xlu0 %13   ;;  %v26_v23 = vpop.permute.xlu1 %25  }
  0x7d   :  { %16 = vst.msk [vmem:[#allocation0] sm:$0x1] %vm15_vm2, %v14_v22   ;;  %v92_v24 = vpop.permute.xlu2 %91  }
  0x7e   :  { %22 = vst.msk [vmem:[#allocation0] sm:$0x1] %vm21_vm3, %v20_v20  }
  0x7f   :  { %28 = vst.msk [vmem:[#allocation0] sm:$0x1] %vm27_vm4, %v26_v23  }
  0x80   :  { %34 = vst.msk [vmem:[#allocation0] sm:$0x1] %vm33_vm5, %v32_v16  }
  0x81   :  { %40 = vst.msk [vmem:[#allocation0] sm:$0x1] %vm39_vm6, %v38_v17  }
  0x84   :  { %v44_v25 = vpop.permute.xlu0 %43   ;;  %v50_v26 = vpop.permute.xlu1 %49  }
  0x85   :  { %46 = vst.msk [vmem:[#allocation0] sm:$0x1] %vm45_vm7, %v44_v25  }
  0x86   :  { %52 = vst.msk [vmem:[#allocation0] sm:$0x1] %vm51_vm8, %v50_v26  }
  0x87   :  { %58 = vst.msk [vmem:[#allocation0] sm:$0x1] %vm57_vm9, %v56_v18  }
  0x8c   :  { %v62_v27 = vpop.permute.xlu0 %61   ;;  %v68_v28 = vpop.permute.xlu1 %67  }
  0x8d   :  { %64 = vst.msk [vmem:[#allocation0] sm:$0x1] %vm63_vm10, %v62_v27  }
  0x8e   :  { %70 = vst.msk [vmem:[#allocation0] sm:$0x1] %vm69_vm11, %v68_v28  }
  0x8f   :  { %76 = vst.msk [vmem:[#allocation0] sm:$0x1] %vm75_vm12, %v74_v21  }
  0x94   :  { %v80_v29 = vpop.permute.xlu0 %79   ;;  %v86_v30 = vpop.permute.xlu1 %85  }
  0x95   :  { %82 = vst.msk [vmem:[#allocation0] sm:$0x1] %vm81_vm13, %v80_v29  }
  0x96   :  { %88 = vst.msk [vmem:[#allocation0] sm:$0x1] %vm87_vm14, %v86_v30  }
  0x97   :  { %94 = vst.msk [vmem:[#allocation0] sm:$0x1] %vm93_vm15, %v92_v24  }
  0x9e   :  { %v97_v31 = vld [vmem:[#allocation0] sm:$0x1] }
  0x9f   :  { %100 = vst [vmem:[%s208_s1] sm:$0x1] %v97_v31 }

// kernel: _conv_sic_forward_impl.1
= control target key start
LH: loop header
LB: loop body
LE: loop exit
PB: predicated region body
PF: predicated region fallthrough
CT: control target
= control target key end

     0   :  { %s670_s15 = smov 0   ;;  %s746_s0 = inlined_call_operand.vmem [shape: bf16[2,16,64], index: 0, kind: input, shape index: {}]   ;;  %s747_s1 = inlined_call_operand.vmem [shape: bf16[3,16,16], index: 1, kind: input, shape index: {}]   ;;  %s748_s2 = inlined_call_operand.vmem [shape: bf16[3,64,64], index: 2, kind: input, shape index: {}]   ;;  %s749_s3 = inlined_call_operand.vmem [shape: f32[1,64], index: 3, kind: input, shape index: {}]   ;;  %s750_s4 = inlined_call_operand.vmem [shape: bf16[2,16,64], index: 4, kind: output, shape index: {}]  }
   0x1 LB: > { %s509_s16 = sadd.s32 4294967295, %s643_s15   ;;  %p513_p0 = scmp.ge.s32.totalorder %s643_s15, 1  ;;  %s643_s15 = sphi %s670_s15, %s14_s15  }
   0x2   : > { %p162_p1 = scmp.lt.s32.totalorder %s643_s15, 3 }
   0x4   : > { %p163_p2 = pnand %p513_p0, %p162_p1 }
   0x5   : > { %p188_p3 = scmp.lt.s32.totalorder (!%p163_p2), %s509_s16, 1 }
   0x6   : > { %166 = sbr.rel (%p163_p2) target bundleno = 319 (0x13f), region = 36 }
   0xb   : > { %v617_v0 = vld [vmem:[%s748_s2 + $0x18] sm:$0xff]  ;;  %s752_s16 = smov (!%p188_p3, %s509_s16), 1  ;;  %v613_v2 = vld [vmem:[%s747_s1] sm:$0xff]  ;;  %v618_v3 = vld [vmem:[%s747_s1 + $0x8] sm:$0xff]  ;;  %vm214_vm0 = vcmask 130048   ;;  %vm269_vm1 = vcmask 523264  }
   0xc   : > { %277 = vmatpush.bf16.msra.mxu1 %v617_v0  ;;  %s610_s19 = sshll.u32 %s752_s16, 3  ;;  %v623_v4 = vld [vmem:[%s747_s1 + $0x10] sm:$0xff]  ;;  %v622_v6 = vld [vmem:[%s748_s2 + $0x38] sm:$0xff]  ;;  %v615_v7 = vld [vmem:[%s748_s2 + $0x8] sm:$0xff]  ;;  %vm451_vm2 = vcmask 519168  }
   0xd   : > { %s689_s22 = scalar_lea.vmem %s746_s0, %s610_s19  ;;  %v616_v5 = vld [vmem:[%s748_s2 + $0x10] sm:$0xff]  ;;  %353 = vmatpush.bf16.msra.mxu3 %v622_v6  ;;  %v614_v9 = vld [vmem:[%s748_s2] sm:$0xff]  ;;  %v620_v10 = vld [vmem:[%s748_s2 + $0x28] sm:$0xff]  ;;  %s197_s7 = scalar_lea.vmem %s750_s4, %s610_s19 }
   0xe   : > { %v612_v1 = vld [vmem:[%s689_s22] sm:$0xff]  ;;  %v621_v8 = vld [vmem:[%s748_s2 + $0x30] sm:$0xff]  ;;  %v627_v11 = vld [vmem:[%s748_s2 + $0x58] sm:$0xff] }
   0xf   : > { %225 = vmatpush.bf16.msra.mxu0 %v612_v1  ;;  %305 = vmatpush.bf16.msra.mxu2 %v612_v1  ;;  %v619_v12 = vld [vmem:[%s748_s2 + $0x20] sm:$0xff]  ;;  %v626_v13 = vld [vmem:[%s748_s2 + $0x50] sm:$0xff]  ;;  %v625_v14 = vld [vmem:[%s748_s2 + $0x48] sm:$0xff] }
  0x10   : > { %278 = vmatpush.bf16.msra.mxu1 %v616_v5  ;;  %v624_v15 = vld [vmem:[%s748_s2 + $0x40] sm:$0xff] }
  0x11   : > { %354 = vmatpush.bf16.msra.mxu3 %v621_v8  ;;  %v636_v26 = vld [vmem:[%s749_s3] ss:$0 sm:$0xff] }
  0x12   : > { %526 = vmatmul.msk.bf16.vlgmr.msra.gmra.mxu0 %vm214_vm0, %v613_v2  ;;  %550 = vmatmul.msk.bf16.vlgmr.msra.gmra.mxu2 %vm214_vm0, %v618_v3  ;;  %v199_v28 = vld [vmem:[%s689_s22] sm:$0xff]  }
  0x13   : > { %383 = vmatpush.bf16.msrb.mxu0 %v612_v1  ;;  %431 = vmatpush.bf16.msrb.mxu2 %v627_v11  ;;  %v443_v31 = vunpack.c.l.bf16 %v199_v28  ;;  %v444_v41 = vunpack.c.h.bf16 %v199_v28 }
  0x14   : > { %279 = vmatpush.bf16.msra.mxu1 %v615_v7 }
  0x15   : > { %355 = vmatpush.bf16.msra.mxu3 %v620_v10 }
  0x17   : > { %432 = vmatpush.bf16.msrb.mxu2 %v626_v13 }
  0x18   : > { %280 = vmatpush.bf16.msra.mxu1 %v614_v9 }
  0x19   : > { %356 = vmatpush.bf16.msra.mxu3 %v619_v12 }
  0x1b   : > { %433 = vmatpush.bf16.msrb.mxu2 %v625_v14 }
  0x1f   : > { %434 = vmatpush.bf16.msrb.mxu2 %v624_v15 }
  0x22   : > { %582 = vmatmul.msk.bf16.vlgmr.msrb.gmra.mxu0 %vm214_vm0, %v623_v4 }
  0x8f   : > { %v227_v16 = vpop.f32.mrf.mxu0 }
  0x95   : > { %v307_v17 = vpop.f32.mrf.mxu2 }
  0x97   : > { %v229_v18 = vpop.f32.mrf.mxu0 }
  0x98   : > { %v232_v19 = vpack.c.bf16 %v229_v18, %v227_v16 }
  0x9a   : > { %543 = vmatmul.msk.bf16.vlgmr.msra.gmra.mxu1 %vm269_vm1, %v232_v19 }
  0x9d   : > { %v309_v20 = vpop.f32.mrf.mxu2 }
  0x9e   : > { %v312_v21 = vpack.c.bf16 %v309_v20, %v307_v17 }
  0x9f   : > { %v385_v22 = vpop.f32.mrf.mxu0 }
  0xa0   : > { %575 = vmatmul.msk.bf16.vlgmr.msra.gmra.mxu3 %vm269_vm1, %v312_v21 }
  0xa7   : > { %v387_v23 = vpop.f32.mrf.mxu0 }
  0xa8   : > { %v390_v24 = vpack.c.bf16 %v387_v23, %v385_v22 }
  0xaa   : > { %607 = vmatmul.msk.bf16.vlgmr.msrb.gmra.mxu2 %vm269_vm1, %v390_v24 }
 0x117   : > { %v282_v25 = vpop.f32.mrf.mxu1 }
 0x118   : > { %v283_v29 = vadd.f32 %v636_v26, %v282_v25 }
 0x11f   : > { %v284_v34 = vpop.f32.mrf.mxu1 }
 0x120   : > { %v285_v37 = vadd.f32 %v636_v26, %v284_v34 }
 0x123   : > { %v358_v27 = vpop.f32.mrf.mxu3 }
 0x124   : > { %v363_v30 = vadd.f32 %v358_v27, %v283_v29 }
 0x12b   : > { %v360_v36 = vpop.f32.mrf.mxu3 }
 0x12c   : > { %v364_v39 = vadd.f32 %v360_v36, %v285_v37 }
 0x12d   : > { %v436_v32 = vpop.f32.mrf.mxu2 }
 0x12e   : > { %v441_v33 = vadd.f32 %v436_v32, %v363_v30 }
 0x130   : > { %v445_v35 = vadd.f32 %v443_v31, %v441_v33 }
 0x132   : > { %v447_v38 = vmax.f32 %v445_v35, 0.0 }
 0x134   : > { %v449_v40 = vpack.c.bf16 %v447_v38, %v447_v38 }
 0x135   : > { %v438_v42 = vpop.f32.mrf.mxu2 }
 0x136   : > { %452 = vst.msk [vmem:[%s197_s7] sm:$0xf] %vm451_vm2, %v449_v40  ;;  %v442_v43 = vadd.f32 %v438_v42, %v364_v39 }
 0x138   : > { %v446_v44 = vadd.f32 %v444_v41, %v442_v43 }
 0x13a   : > { %v448_v45 = vmax.f32 %v446_v44, 0.0 }
 0x13c   : > { %v450_v46 = vpack.c.bf16 %v448_v45, %v448_v45 }
 0x13e   : > { %453 = vst.msk [vmem:[%s197_s7 + $0x4] sm:$0xf] %vm451_vm2, %v450_v46 }
 0x13f PF: > { %s14_s15 = sadd.s32 1, %s643_s15  }
 0x140   : > { %p11_p4 = scmp.ge.s32.totalorder %s14_s15, 4  }
 0x142   :  { %13 = sbr.rel (!%p11_p4) target bundleno = 1 (0x1), region = 70 }

</bundles_post_ra>
